<compile_context>
chip_gen: v7x
topology: tpu7x:2x2x1
jax: 0.10.0
libtpu: 0.0.40
codegen_flags: <defaults>
</compile_context>

<pallas_src>
import functools

import numpy as np
import jax
import jax.numpy as jnp
from jax import lax
from jax.experimental import pallas as pl
from jax.experimental.pallas import tpu as pltpu


_HIGHEST = lax.Precision.HIGHEST


# ---------------------------------------------------------------------------
# Hardware-aware sizing helpers.
# ---------------------------------------------------------------------------

def _vmem_capacity_bytes():
    """Physical VMEM of the current TPU generation (fallback: v7x's 64 MiB)."""
    try:
        info = pltpu.get_tpu_info()
        cap = int(getattr(info, "vmem_capacity_bytes", 0))
        if cap > 0:
            return cap
    except Exception:
        pass
    return 64 << 20


def _vmem_limit(block_bytes, vmem_cap):
    """Scoped VMEM limit: double-buffered blocks + headroom, capped below HW."""
    return int(min(vmem_cap - (8 << 20), max(2 * block_bytes + (2 << 20), 32 << 20)))


def _pick_s_tile(s, h, itemsize, vmem_cap, s_tile=None):
    """Largest S-tile that divides S, is a multiple of 8 (sublane layout), and
    keeps the dominant (tS, H) block within ~VMEM/8 (<= 16 MiB)."""
    if s_tile is not None and s % s_tile == 0 and (s_tile % 8 == 0 or s_tile == s):
        return int(s_tile)
    if s <= 8:
        return s
    target = max(min(vmem_cap // 8, 16 << 20), 1 << 20)
    best = None
    smallest = None
    for t in range(8, s + 1, 8):
        if s % t:
            continue
        if smallest is None:
            smallest = t
        if t * h * itemsize <= target:
            best = t                      # keeps growing -> largest fitting divisor
    if best is not None:
        return best
    if smallest is not None:
        return smallest
    return s                              # no multiple-of-8 divisor: full rows


def _maybe_cast(a, dtype):
    return a if dtype is None or a.dtype == dtype else a.astype(dtype)


# ---------------------------------------------------------------------------
# Kernels.  P is carried transposed (lane-dense) as (R, H).
# ---------------------------------------------------------------------------

def _power_iter_resident_kernel(x_ref, pt_ref, pt_out_ref, *, n_plain, compute_dtype):
    """n_plain un-orthogonalized power iterations with one X row resident in VMEM.

    x_ref: (1, S, H); pt_ref / pt_out_ref: (1, R, H).  X is streamed
    HBM->VMEM once for all n_plain iterations (dominant traffic, R << S, H).
    """
    x = _maybe_cast(x_ref[0], compute_dtype)                       # (S, H)

    def body(_, pt):                                               # pt: (R, H) f32
        # Q = X @ P: contract H of X with H of P^T -> (S, R).
        q = lax.dot_general(x, _maybe_cast(pt, compute_dtype),
                            (((1,), (1,)), ((), ())),
                            preferred_element_type=jnp.float32)
        # P^T = Q^T @ X: contract S of Q with S of X -> (R, H), lane-dense H.
        return lax.dot_general(_maybe_cast(q, compute_dtype), x,
                               (((0,), (0,)), ((), ())),
                               preferred_element_type=jnp.float32)

    pt = pt_ref[0].astype(jnp.float32)
    if n_plain <= 4:                         # short: static unroll
        for _ in range(n_plain):
            pt = body(0, pt)
    else:                                    # rolled loop bounds vreg live ranges
        pt = lax.fori_loop(0, n_plain, body, pt)
    pt_out_ref[0] = pt


def _power_iter_tiled_kernel(x_ref, pt_ref, pt_out_ref, *, compute_dtype):
    """One un-orthogonalized power iteration, S-tiled (grid = (B, S//tS)).

    The S axis is an 'arbitrary' reduction: the (1, R, H) output block stays
    resident and accumulates X_tile^T @ (X_tile @ P).  X is read once/iter.
    """
    @pl.when(pl.program_id(1) == 0)
    def _():
        pt_out_ref[...] = jnp.zeros_like(pt_out_ref)

    x = _maybe_cast(x_ref[0], compute_dtype)                       # (tS, H)
    q = lax.dot_general(x, _maybe_cast(pt_ref[0], compute_dtype),
                        (((1,), (1,)), ((), ())),
                        preferred_element_type=jnp.float32)        # (tS, R)
    contrib = lax.dot_general(_maybe_cast(q, compute_dtype), x,
                              (((0,), (0,)), ((), ())),
                              preferred_element_type=jnp.float32)  # (R, H)
    pt_out_ref[0] = pt_out_ref[0] + contrib


def _xp_kernel(x_ref, pt_ref, q_ref, *, precision):
    # Q_tile = X_tile @ P: contract H of X with H of P^T -> (tS, R).
    q_ref[0] = lax.dot_general(x_ref[0], pt_ref[0], (((1,), (1,)), ((), ())),
                               preferred_element_type=jnp.float32,
                               precision=precision).astype(q_ref.dtype)


def _xtq_kernel(x_ref, q_ref, pt_out_ref, *, precision):
    # P^T += Q_tile^T @ X_tile: contract the S tile of both -> (R, H).
    @pl.when(pl.program_id(1) == 0)
    def _():
        pt_out_ref[...] = jnp.zeros_like(pt_out_ref)
    contrib = lax.dot_general(q_ref[0], x_ref[0], (((0,), (0,)), ((), ())),
                              preferred_element_type=jnp.float32,
                              precision=precision)
    pt_out_ref[0] = pt_out_ref[0] + contrib


def _qpt_kernel(q_ref, pt_ref, o_ref, *, precision):
    # result_tile = Q_tile @ P^T: contract R -> (tS, H); H lane-dense output.
    o_ref[0] = lax.dot_general(q_ref[0], pt_ref[0], (((1,), (0,)), ((), ())),
                               preferred_element_type=jnp.float32,
                               precision=precision).astype(o_ref.dtype)


# ---------------------------------------------------------------------------
# pallas_call builders.
# ---------------------------------------------------------------------------

def _plain_iterations(x3, pt, n_plain, vmem_cap, compute_dtype,
                      max_resident_bytes=None, s_tile=None):
    b, s, h = x3.shape
    r = pt.shape[1]
    itemsize = x3.dtype.itemsize

    resident_budget = vmem_cap // 3 if max_resident_bytes is None else max_resident_bytes
    if s * h * itemsize <= resident_budget:
        # X row resident in VMEM: read X from HBM once for all n_plain iterations.
        block_bytes = s * h * itemsize + 2 * r * h * 4
        return pl.pallas_call(
            functools.partial(_power_iter_resident_kernel,
                              n_plain=n_plain, compute_dtype=compute_dtype),
            out_shape=jax.ShapeDtypeStruct((b, r, h), jnp.float32),
            grid_spec=pltpu.PrefetchScalarGridSpec(
                num_scalar_prefetch=0,
                grid=(b,),
                in_specs=[pl.BlockSpec((1, s, h), lambda i: (i, 0, 0)),
                          pl.BlockSpec((1, r, h), lambda i: (i, 0, 0))],
                out_specs=pl.BlockSpec((1, r, h), lambda i: (i, 0, 0))),
            compiler_params=pltpu.CompilerParams(
                dimension_semantics=("parallel",),
                vmem_limit_bytes=_vmem_limit(block_bytes, vmem_cap)),
        )(x3, pt)

    # Tiled fallback: one S-tiled kernel per plain iteration (X read once each).
    ts = _pick_s_tile(s, h, itemsize, vmem_cap, s_tile)
    block_bytes = ts * h * itemsize + 2 * r * h * 4
    call = pl.pallas_call(
        functools.partial(_power_iter_tiled_kernel, compute_dtype=compute_dtype),
        out_shape=jax.ShapeDtypeStruct((b, r, h), jnp.float32),
        grid_spec=pltpu.PrefetchScalarGridSpec(
            num_scalar_prefetch=0,
            grid=(b, s // ts),
            in_specs=[pl.BlockSpec((1, ts, h), lambda i, j: (i, j, 0)),
                      pl.BlockSpec((1, r, h), lambda i, j: (i, 0, 0))],
            out_specs=pl.BlockSpec((1, r, h), lambda i, j: (i, 0, 0))),
        compiler_params=pltpu.CompilerParams(
            dimension_semantics=("parallel", "arbitrary"),
            vmem_limit_bytes=_vmem_limit(block_bytes, vmem_cap)),
    )
    for _ in range(n_plain):
        pt = call(x3, pt)
    return pt


def _xp_call(x3, pt, vmem_cap, precision, s_tile=None):
    b, s, h = x3.shape
    r = pt.shape[1]
    itemsize = x3.dtype.itemsize
    ts = _pick_s_tile(s, h, itemsize, vmem_cap, s_tile)
    block_bytes = ts * h * itemsize + r * h * 4 + ts * r * 4
    return pl.pallas_call(
        functools.partial(_xp_kernel, precision=precision),
        out_shape=jax.ShapeDtypeStruct((b, s, r), jnp.float32),
        grid_spec=pltpu.PrefetchScalarGridSpec(
            num_scalar_prefetch=0,
            grid=(b, s // ts),
            in_specs=[pl.BlockSpec((1, ts, h), lambda i, j: (i, j, 0)),
                      pl.BlockSpec((1, r, h), lambda i, j: (i, 0, 0))],
            out_specs=pl.BlockSpec((1, ts, r), lambda i, j: (i, j, 0))),
        compiler_params=pltpu.CompilerParams(
            dimension_semantics=("parallel", "parallel"),
            vmem_limit_bytes=_vmem_limit(block_bytes, vmem_cap)),
    )(x3, pt)


def _xtq_call(x3, q, vmem_cap, precision, s_tile=None):
    b, s, h = x3.shape
    r = q.shape[2]
    itemsize = x3.dtype.itemsize
    ts = _pick_s_tile(s, h, itemsize, vmem_cap, s_tile)
    block_bytes = ts * h * itemsize + ts * r * 4 + r * h * 4
    return pl.pallas_call(
        functools.partial(_xtq_kernel, precision=precision),
        out_shape=jax.ShapeDtypeStruct((b, r, h), jnp.float32),
        grid_spec=pltpu.PrefetchScalarGridSpec(
            num_scalar_prefetch=0,
            grid=(b, s // ts),
            in_specs=[pl.BlockSpec((1, ts, h), lambda i, j: (i, j, 0)),
                      pl.BlockSpec((1, ts, r), lambda i, j: (i, j, 0))],
            out_specs=pl.BlockSpec((1, r, h), lambda i, j: (i, 0, 0))),
        compiler_params=pltpu.CompilerParams(
            dimension_semantics=("parallel", "arbitrary"),
            vmem_limit_bytes=_vmem_limit(block_bytes, vmem_cap)),
    )(x3, q)


def _qpt_call(q, pt, out_dtype, vmem_cap, precision, s_tile=None):
    b, s, r = q.shape
    h = pt.shape[2]
    out_itemsize = np.dtype(out_dtype).itemsize
    ts = _pick_s_tile(s, h, max(out_itemsize, 4), vmem_cap, s_tile)
    block_bytes = ts * r * 4 + r * h * 4 + ts * h * out_itemsize
    return pl.pallas_call(
        functools.partial(_qpt_kernel, precision=precision),
        out_shape=jax.ShapeDtypeStruct((b, s, h), out_dtype),
        grid_spec=pltpu.PrefetchScalarGridSpec(
            num_scalar_prefetch=0,
            grid=(b, s // ts),
            in_specs=[pl.BlockSpec((1, ts, r), lambda i, j: (i, j, 0)),
                      pl.BlockSpec((1, r, h), lambda i, j: (i, 0, 0))],
            out_specs=pl.BlockSpec((1, ts, h), lambda i, j: (i, j, 0))),
        compiler_params=pltpu.CompilerParams(
            dimension_semantics=("parallel", "parallel"),
            vmem_limit_bytes=_vmem_limit(block_bytes, vmem_cap)),
    )(q, pt)


# ---------------------------------------------------------------------------
# Forward wrapper (mirrors the torch autograd.Function forward).
# ---------------------------------------------------------------------------

def powersvd_nlp_forward(x, p0, q0, n_iter, *,
                         plain_compute_dtype=jnp.bfloat16,
                         final_precision=_HIGHEST,
                         max_resident_bytes=None,
                         s_tile=None):
    """Forward of PowerSVD1 / PowerSVDLayerNLP.  Returns (result, new_p, new_q)."""
    orig_shape = x.shape
    b, s = x.shape[0], x.shape[1]
    # input.view(B, S, -1): free metadata reshape; folded into the matmul tiling.
    x3 = jnp.reshape(x, (b, s, -1))
    vmem_cap = _vmem_capacity_bytes()

    # Carry P lane-dense (B, R, H) inside the Pallas pipeline (H on lanes).
    pt = jnp.transpose(p0, (0, 2, 1)).astype(jnp.float32)

    if n_iter <= 0:
        result = _qpt_call(q0.astype(jnp.float32), pt, x.dtype, vmem_cap,
                           final_precision, s_tile)
        return jnp.reshape(result, orig_shape), p0, q0

    n_plain = n_iter - 1
    if n_plain > 0:
        pt = _plain_iterations(x3, pt, n_plain, vmem_cap, plain_compute_dtype,
                               max_resident_bytes, s_tile)

    # Final (orthogonalized) iteration — full f32 precision.
    # TODO(synk): batched QR has no Pallas primitive; use XLA's QR at the boundary.
    p_qr = jnp.linalg.qr(jnp.transpose(pt, (0, 2, 1)))[0]        # (B, H, R)
    pt = jnp.transpose(p_qr, (0, 2, 1))                          # lane-dense again
    q = _xp_call(x3, pt, vmem_cap, final_precision, s_tile)      # Q = X @ P
    q = jnp.linalg.qr(q)[0]
    pt = _xtq_call(x3, q, vmem_cap, final_precision, s_tile)     # P = X^T @ Q
    result = _qpt_call(q, pt, x.dtype, vmem_cap, final_precision, s_tile)
    new_p = jnp.transpose(pt, (0, 2, 1)).astype(p0.dtype)        # (B, H, R) buffer layout
    new_q = q.astype(q0.dtype)
    return jnp.reshape(result, orig_shape), new_p, new_q


class PowerSVDLayerNLP:
    """JAX/Pallas mirror of the PyTorch module (stateful p/q buffers)."""

    def __init__(self, rank, shape, n_iter, key):
        kp, kq, kgp, kgq = jax.random.split(key, 4)
        b, s, h = int(shape[0]), int(shape[1]), int(shape[2])
        self.p_buffer = [jax.random.normal(kp, (b, h, rank), jnp.float32)]
        self.q_buffer = [jax.random.normal(kq, (b, s, rank), jnp.float32)]
        self.grad_p_buffer = [jax.random.normal(kgp, (b, h, rank), jnp.float32)]
        self.grad_q_buffer = [jax.random.normal(kgq, (b, s, rank), jnp.float32)]
        self.iter = n_iter

    def __call__(self, x):
        out, new_p, new_q = powersvd_nlp_forward(
            x, self.p_buffer[0], self.q_buffer[0], self.iter)
        self.p_buffer[0] = new_p
        self.q_buffer[0] = new_q
        return out


# ---------------------------------------------------------------------------
# Pure-JAX reference (torch forward with the same precision scheme).
# ---------------------------------------------------------------------------

def _reference_forward(x, p0, n_iter, plain_compute_dtype=jnp.bfloat16,
                       final_precision=_HIGHEST):
    shape = x.shape
    x3 = x.reshape(x.shape[0], x.shape[1], -1)
    p = p0.astype(jnp.float32)
    q = None
    for i in range(n_iter):
        if i == n_iter - 1:
            p = jnp.linalg.qr(p)[0]
            q = jnp.einsum('bsh,bhr->bsr', x3, p, precision=final_precision)
            q = jnp.linalg.qr(q)[0]
            p = jnp.einsum('bsh,bsr->bhr', x3, q, precision=final_precision)
        else:
            xc = x3.astype(plain_compute_dtype)
            q = jnp.einsum('bsh,bhr->bsr', xc, p.astype(plain_compute_dtype),
                           preferred_element_type=jnp.float32)
            p = jnp.einsum('bsh,bsr->bhr', xc, q.astype(plain_compute_dtype),
                           preferred_element_type=jnp.float32)
    return jnp.einsum('bsr,bhr->bsh', q, p, precision=final_precision).reshape(shape)


if __name__ == "__main__":
    key = jax.random.PRNGKey(0)
    kx, klayer, kx2, kp2, kq2 = jax.random.split(key, 5)

    # --- Test 1: module-style call at small NLP shapes (resident-X path). ---
    B, S, H, RANK, ITER = 2, 8, 128, 4, 2
    x = jax.random.normal(kx, (B, S, H), dtype=jnp.float32)

    layer = PowerSVDLayerNLP(RANK, (B, S, H), ITER, klayer)
    p0 = layer.p_buffer[0]       # snapshot before the stateful forward mutates it

    out = layer(x)
    jax.block_until_ready(out)

    ref = _reference_forward(x, p0, ITER)
    assert out.shape == x.shape and out.dtype == x.dtype
    err1 = float(jnp.max(jnp.abs(out - ref)))
    assert jnp.allclose(out, ref, rtol=1e-2, atol=1e-2), f"test1 max abs err = {err1}"

    # --- Test 2: force the S-tiled reduction + tiled plain-iteration path. ---
    B2, S2, H2, R2, ITER2 = 2, 64, 256, 4, 2
    x2 = jax.random.normal(kx2, (B2, S2, H2), dtype=jnp.float32)
    p2 = jax.random.normal(kp2, (B2, H2, R2), dtype=jnp.float32)
    q2 = jax.random.normal(kq2, (B2, S2, R2), dtype=jnp.float32)
    out2, _, _ = powersvd_nlp_forward(
        x2, p2, q2, ITER2, max_resident_bytes=0, s_tile=16)
    jax.block_until_ready(out2)
    ref2 = _reference_forward(x2, p2, ITER2)
    err2 = float(jnp.max(jnp.abs(out2 - ref2)))
    assert jnp.allclose(out2, ref2, rtol=1e-2, atol=1e-2), f"test2 max abs err = {err2}"

    print("KERNEL_OK")
</pallas_src>

<mosaic_0001>
module attributes {stable_mosaic.version = 11 : i64} {
  func.func @_power_iter_resident_kernel(%arg0: i32, %arg1: memref<1x8x128xf32, #tpu.memory_space<vmem>>, %arg2: memref<1x4x128xf32, #tpu.memory_space<vmem>>, %arg3: memref<1x4x128xf32, #tpu.memory_space<vmem>>) attributes {dimension_semantics = [#tpu.dimension_semantics<parallel>], iteration_bounds = array<i64: 2>, scalar_prefetch = 0 : i64, scratch_operands = 0 : i64, tpu.core_type = #tpu.core_type<tc>, window_params = [{transform_indices = @transform_0, window_bounds = array<i64: 1, 8, 128>}, {transform_indices = @transform_1, window_bounds = array<i64: 1, 4, 128>}, {transform_indices = @transform_2, window_bounds = array<i64: 1, 4, 128>}]} {
    %c0 = arith.constant 0 : index
    %c0_0 = arith.constant 0 : index
    %c0_1 = arith.constant 0 : index
    %0 = vector.load %arg1[%c0, %c0_0, %c0_1] : memref<1x8x128xf32, #tpu.memory_space<vmem>>, vector<1x8x128xf32>
    %1 = vector.shape_cast %0 : vector<1x8x128xf32> to vector<8x128xf32>
    %2 = arith.truncf %1 : vector<8x128xf32> to vector<8x128xbf16>
    %c0_2 = arith.constant 0 : index
    %c0_3 = arith.constant 0 : index
    %c0_4 = arith.constant 0 : index
    %3 = vector.load %arg2[%c0_2, %c0_3, %c0_4] : memref<1x4x128xf32, #tpu.memory_space<vmem>>, vector<1x4x128xf32>
    %4 = vector.shape_cast %3 : vector<1x4x128xf32> to vector<4x128xf32>
    %5 = arith.truncf %4 : vector<4x128xf32> to vector<4x128xbf16>
    %cst = arith.constant dense<0.000000e+00> : vector<8x4xf32>
    %6 = tpu.matmul %2, %5, %cst {dimension_numbers = #tpu.dot_dimension_numbers<[1], [1], [0], [0], [0, 0, 1, 0], [], []>} : vector<8x128xbf16>, vector<4x128xbf16>, vector<8x4xf32> -> vector<8x4xf32>
    %7 = arith.truncf %6 : vector<8x4xf32> to vector<8x4xbf16>
    %cst_5 = arith.constant dense<0.000000e+00> : vector<4x128xf32>
    %8 = tpu.matmul %7, %2, %cst_5 {dimension_numbers = #tpu.dot_dimension_numbers<[0], [0], [1], [1], [0, 1, 1, 1], [], []>} : vector<8x4xbf16>, vector<8x128xbf16>, vector<4x128xf32> -> vector<4x128xf32>
    %c0_6 = arith.constant 0 : index
    %c0_7 = arith.constant 0 : index
    %c0_8 = arith.constant 0 : index
    %9 = vector.load %arg3[%c0_6, %c0_7, %c0_8] : memref<1x4x128xf32, #tpu.memory_space<vmem>>, vector<1x4x128xf32>
    %10 = vector.shape_cast %9 : vector<1x4x128xf32> to vector<4x128xf32>
    %11 = vector.shape_cast %8 : vector<4x128xf32> to vector<1x4x128xf32>
    tpu.vector_store %arg3[%c0_6, %c0_7, %c0_8], %11 {strides = array<i32>} : memref<1x4x128xf32, #tpu.memory_space<vmem>>, vector<1x4x128xf32>,
    return
  }
  func.func @transform_0(%arg0: i32) -> (i32, i32, i32) {
    %c0_i32 = arith.constant 0 : i32
    %c0_i32_0 = arith.constant 0 : i32
    %c0_i32_1 = arith.constant 0 : i32
    return %arg0, %c0_i32, %c0_i32_0 : i32, i32, i32
  }
  func.func @transform_1(%arg0: i32) -> (i32, i32, i32) {
    %c0_i32 = arith.constant 0 : i32
    %c0_i32_0 = arith.constant 0 : i32
    %c0_i32_1 = arith.constant 0 : i32
    return %arg0, %c0_i32, %c0_i32_0 : i32, i32, i32
  }
  func.func @transform_2(%arg0: i32) -> (i32, i32, i32) {
    %c0_i32 = arith.constant 0 : i32
    %c0_i32_0 = arith.constant 0 : i32
    %c0_i32_1 = arith.constant 0 : i32
    return %arg0, %c0_i32, %c0_i32_0 : i32, i32, i32
  }
}

</mosaic_0001>

<bundles_post_ra>
// kernel: tpu_custom_call.1
= control target key start
LH: loop header
LB: loop body
LE: loop exit
PB: predicated region body
PF: predicated region fallthrough
CT: control target
= control target key end

     0   :  { %7 = vsyncpa [#allocation3], 0  ;;  %s856_s0 = inlined_call_operand.hbm [shape: f32[2,8,128], index: 0, kind: input, shape index: {}]   ;;  %s857_s1 = inlined_call_operand.hbm [shape: f32[2,4,128], index: 1, kind: input, shape index: {}]   ;;  %s858_s2 = inlined_call_operand.hbm [shape: f32[2,4,128], index: 2, kind: output, shape index: {}]  }
   0x1   :  { %9 = vsyncpa [#allocation3 + $0x1], 0 }
   0x2   :  { %10 = vsyncpa [#allocation6], 0 }
   0x3   :  { %12 = vsyncpa [#allocation6 + $0x1], 0 }
   0x4   :  { %13 = vsyncpa [#allocation4], 0 }
   0x5   :  { %15 = vsyncpa [#allocation4 + $0x1], 0  ;;  %s652_s9 = smov 0   ;;  %s654_s10 = smov 0  }
   0x6   :  { %s656_s11 = smov 0   ;;  %s658_s12 = smov 0  }
   0x7 LB: > { %s673_s13 = sadd.s32 4294967295, %s630_s12   ;;  %s414_s14 = sadd.s32 4294967294, %s630_s12   ;;  %s630_s12 = sphi %s658_s12, %s877_s12   ;;  %s626_s11 = sphi %s656_s11, %s876_s11   ;;  %s622_s10 = sphi %s654_s10, %s875_s10   ;;  %s618_s9 = sphi %s652_s9, %s874_s9  }
   0x8   : > { %s677_s15 = sadd.s32 1, %s630_s12   ;;  %s28_s16 = sadd.s32 1, %s626_s11 }
   0x9   : > { %s25_s17 = ssub.s32 %s630_s12, %s677_s15  ;;  %p35_p0 = scmp.ne.s32.totalorder %s626_s11, %s622_s10 }
   0xa   : > { %p26_p1 = scmp.eq.s32.totalorder %s25_s17, 0  ;;  %p36_p2 = scmp.eq.s32.totalorder %s630_s12, 0 }
   0xb   : > { %p41_p3 = scmp.ne.s32.totalorder %s622_s10, %s618_s9  ;;  %p42_p4 = scmp.eq.s32.totalorder %s673_s13, 0 }
   0xc   : > { %s689_s18 = scalar_select %p26_p1, %s626_s11, %s28_s16  }
   0xd   : > { %p691_p5 = por %p36_p2, %p35_p0  ;;  %p695_p6 = por %p42_p4, %p41_p3 }
   0xe   : > { %p91_p7 = scmp.eq.s32.totalorder %s673_s13, 1  ;;  %p97_p8 = scmp.eq.s32.totalorder %s414_s14, 1 }
   0xf   : > { %s862_s20 = scalar_select %p695_p6, 1, 0 }
  0x10   : > { %p463_p10 = scmp.lt.s32.totalorder %s630_s12, 2  ;;  %p702_p11 = por %p91_p7, %p35_p0 }
  0x11   : > { %p706_p12 = por %p97_p8, %p41_p3  ;;  %s711_s23 = sand.u32 1, %s626_s11  }
  0x12   : > { %s863_s21 = scalar_select %p702_p11, 1, 0 }
  0x13   : > { %s864_s22 = scalar_select %p706_p12, 1, 0 }
  0x14   : > { %s418_s24 = sshll.u32 %s630_s12, 7  ;;  %s417_s25 = sshll.u32 %s711_s23, 3 }
  0x15   : > { %s718_s28 = scalar_lea.hbm %s856_s0, %s418_s24  ;;  %s121_s29 = scalar_lea.vmem [#allocation2], %s417_s25 }
  0x16   : > { %s128_s30 = sshll.u32 %s121_s29, 4  ;;  %p722_p13 = pnand %p463_p10, %p691_p5  ;;  %s726_s30 = int_to_ptr.vmem [resolvable:$true] %s128_s30 }
  0x17   : > { %s118_s4 = scalar_lea.sflag [#allocation3], %s711_s23  ;;  %s500_s5 = scalar_lea.hbm %s718_s28, 128 }
  0x18   : > { %p501_p2 = scmp.ne.s32.totalorder %s718_s28, %s500_s5  ;;  %p502_p3 = pneg %p722_p13 }
  0x19   : > { %s505_s8 = scalar_lea.hbm %s856_s0, 256  ;;  %p506_p5 = scmp.lt.u32.totalorder %s718_s28, %s856_s0 }
  0x1a   : > { %p503_p4 = pnand %p502_p3, %p501_p2  ;;  %p507_p8 = scmp.lt.u32.totalorder %s505_s8, %s500_s5 }
  0x1b   : > { %p509_p9 = scmp.lt.u32.totalorder %s500_s5, %s718_s28 }
  0x1c   : > { %p504_p7 = pneg %p503_p4  ;;  %p508_p10 = por %p507_p8, %p506_p5 }
  0x1e   : > { %p510_p0 = por %p509_p9, %p508_p10 }
  0x20   : > { %p511_p1 = pnand %p510_p0, %p504_p7 }
  0x22   : > { %514 = shalt.err (!%p511_p1)
}
  0x23   : > { %s515_s17 = scalar_lea.vmem %s726_s30, 128  ;;  %s632_s19 = smov [#allocation2]  }
  0x24   : > { %p516_p2 = scmp.ne.s32.totalorder %s726_s30, %s515_s17  ;;  %s520_s24 = sshll.u32 %s632_s19, 4  ;;  %s521_s24 = int_to_ptr.vmem [resolvable:$false] %s520_s24 }
  0x25   : > { %s522_s25 = scalar_lea.vmem %s521_s24, 256  ;;  %p523_p11 = scmp.lt.s32.totalorder %s726_s30, %s521_s24 }
  0x26   : > { %p518_p4 = pnand %p516_p2, %p502_p3  ;;  %p524_p5 = scmp.lt.s32.totalorder %s522_s25, %s515_s17 }
  0x28   : > { %p519_p12 = pneg %p518_p4  ;;  %p525_p8 = por %p524_p5, %p523_p11 }
  0x2a   : > { %p526_p9 = pnand %p525_p8, %p519_p12 }
  0x2c   : > { %529 = shalt.err (!%p526_p9)
}
  0x2d   : > { %455 = dma.hbm_to_vmem [thread:$0]  (!%p722_p13), %s718_s28, 128, %s726_s30, %s118_s4  }
  0x2e   : > { %p866_p0 = scmp.lt.s32.totalorder %s630_s12, 3  ;;  %p867_p1 = scmp.ge.s32.totalorder %s630_s12, 1 }
  0x2f   : > { %s419_s27 = sshll.u32 %s711_s23, 2  ;;  %s420_s29 = sshll.u32 %s630_s12, 6 }
  0x30   : > { %p760_p7 = pnand %p867_p1, %p866_p0  ;;  %s769_s7 = scalar_lea.hbm %s857_s1, %s420_s29 }
  0x31   : > { %s139_s8 = scalar_lea.vmem [#allocation5], %s419_s27  ;;  %s136_s28 = scalar_lea.sflag [#allocation6], %s711_s23 }
  0x32   : > { %s868_s26 = scalar_select %p760_p7, 1, 0 }
  0x33   : > { %s146_s14 = sshll.u32 %s139_s8, 4  ;;  %s530_s30 = scalar_lea.hbm %s769_s7, 64  ;;  %s147_s14 = int_to_ptr.vmem [resolvable:$true] %s146_s14 }
  0x34   : > { %p531_p11 = scmp.ne.s32.totalorder %s769_s7, %s530_s30  ;;  %s535_s17 = scalar_lea.hbm %s857_s1, 128 }
  0x35   : > { %p536_p2 = scmp.lt.u32.totalorder %s769_s7, %s857_s1  ;;  %p537_p4 = scmp.lt.u32.totalorder %s535_s17, %s530_s30 }
  0x36   : > { %p533_p12 = pnand %p531_p11, %p502_p3  ;;  %p539_p8 = scmp.lt.u32.totalorder %s530_s30, %s769_s7 }
  0x37   : > { %p538_p5 = por %p537_p4, %p536_p2 }
  0x38   : > { %p534_p10 = pneg %p533_p12 }
  0x39   : > { %p540_p9 = por %p539_p8, %p538_p5 }
  0x3b   : > { %p541_p0 = pnand %p540_p9, %p534_p10 }
  0x3d   : > { %544 = shalt.err (!%p541_p0)
}
  0x3e   : > { %s545_s23 = scalar_lea.vmem %s147_s14, 64  ;;  %s633_s25 = smov [#allocation5]  }
  0x3f   : > { %p546_p1 = scmp.ne.s32.totalorder %s147_s14, %s545_s23  ;;  %s550_s27 = sshll.u32 %s633_s25, 4  ;;  %s551_s27 = int_to_ptr.vmem [resolvable:$false] %s550_s27 }
  0x40   : > { %s552_s29 = scalar_lea.vmem %s551_s27, 128  ;;  %p553_p6 = scmp.lt.s32.totalorder %s147_s14, %s551_s27 }
  0x41   : > { %p548_p11 = pnand %p546_p1, %p502_p3  ;;  %p554_p7 = scmp.lt.s32.totalorder %s552_s29, %s545_s23 }
  0x43   : > { %p549_p12 = pneg %p548_p11  ;;  %p555_p2 = por %p554_p7, %p553_p6 }
  0x45   : > { %p556_p4 = pnand %p555_p2, %p549_p12 }
  0x47   : > { %559 = shalt.err (!%p556_p4)
}
  0x48   : > { %458 = dma.hbm_to_vmem [thread:$0]  (!%p722_p13), %s769_s7, 64, %s147_s14, %s136_s28  }
  0x49   : > { %p869_p10 = scmp.ne.s32.totalorder %s868_s26, 0 }
  0x4a   : > { %s794_s5 = sand.u32 (!%p869_p10), 1, %s622_s10   ;;  %p870_p3 = scmp.ne.s32.totalorder (!%p869_p10), %s862_s20, 0 }
  0x4b   : > { %155 = sbr.rel (%p869_p10) target bundleno = 640 (0x280), region = 28  ;;  %s422_s6 = sshll.u32 (!%p869_p10), %s794_s5, 3 }
  0x4c   : > { %s158_s8 = scalar_lea.sflag (!%p869_p10), [#allocation3], %s794_s5  ;;  %s161_s30 = scalar_lea.vmem (!%p869_p10), [#allocation2], %s422_s6 }
  0x52   : > { %605 = dma.done.wait (%p870_p3), %s158_s8, 128  }
  0x53   : > { %607 = vsyncadd (%p870_p3), %s158_s8, 4294967168  ;;  %s423_s3 = sshll.u32 %s794_s5, 2  ;;  %s167_s26 = scalar_lea.sflag [#allocation6], %s794_s5 }
  0x54   : > { %s170_s7 = scalar_lea.vmem [#allocation5], %s423_s3 }
  0x55   : > { %609 = dma.done.wait (%p870_p3), %s167_s26, 64  }
  0x56   : > { %611 = vsyncadd (%p870_p3), %s167_s26, 4294967232  ;;  %v634_v0 = vmov 0.0   ;;  %vm635_vm0 = vmmov 0   ;;  %v199_v1 = vld [vmem:[%s170_s7] sm:$0xf]  ;;  %v197_v3 = vld [vmem:[%s161_s30] sm:$0xff] }
  0x57   : > { %434 = vmatprep.subr.bf16.mxu0 %v634_v0  ;;  %436 = vmatprep.mubr.msk.bf16.mxu0 %vm635_vm0, %v634_v0  ;;  %v200_v2 = vpack.c.bf16 %v199_v1, %v199_v1  ;;  %v198_v4 = vpack.c.bf16 %v197_v3, %v197_v3  ;;  %vm262_vm1 = vcmask 1043456   ;;  %vm258_vm2 = vcmask 64512   ;;  %s195_s20 = scalar_lea.vmem [#allocation7], %s423_s3  ;;  %s427_s28 = sshll.u32 %s673_s13, 6 }
  0x58   : > { %440 = vmatprep.subr.bf16.mxu1 %v634_v0  ;;  %442 = vmatprep.mubr.msk.bf16.mxu1 %vm635_vm0, %v634_v0  ;;  %s321_s14 = sshll.u32 %s195_s20, 4  ;;  %s814_s17 = scalar_lea.hbm %s858_s2, %s427_s28  ;;  %s809_s14 = int_to_ptr.vmem [resolvable:$true] %s321_s14 }
  0x59   : > { %435 = vmatpush3.bf16.xpose.msra.mxu0 %v200_v2  ;;  %v264_v5 = vsel %vm262_vm1, %v198_v4, 0  ;;  %s308_s19 = scalar_lea.sflag [#allocation4], %s794_s5  ;;  %s560_s24 = scalar_lea.vmem %s809_s14, 64 }
  0x5a   : > { %441 = vmatpush3.bf16.msra.mxu1 %v264_v5  ;;  %p561_p6 = scmp.ne.s32.totalorder %s809_s14, %s560_s24  ;;  %p871_p13 = scmp.ne.s32.totalorder %s863_s21, 0 }
  0x5b   : > { %s636_s13 = smov [#allocation7]  }
  0x5c   : > { %p562_p7 = pnand %p561_p6, %p871_p13  ;;  %s564_s23 = sshll.u32 %s636_s13, 4  ;;  %s565_s23 = int_to_ptr.vmem [resolvable:$false] %s564_s23 }
  0x5d   : > { %s566_s25 = scalar_lea.vmem %s565_s23, 128  ;;  %p567_p8 = scmp.lt.s32.totalorder %s809_s14, %s565_s23 }
  0x5e   : > { %p563_p5 = pneg %p562_p7  ;;  %p568_p9 = scmp.lt.s32.totalorder %s566_s25, %s560_s24 }
  0x60   : > { %437 = vmatmul.mubr.bf16.vlgmr.msra.gmra.mrb[0].mxu0 %v198_v4  ;;  %p569_p0 = por %p568_p9, %p567_p8 }
  0x62   : > { %p570_p1 = pnand %p569_p0, %p563_p5 }
 0x133   : > { %v235_v6 = vpop.f32.mrb[0].mxu0 }
 0x134   : > { %v438_v7 = vpop.f32.mrb[1].mxu0  ;;  %v241_v8 = vpack.c.bf16 %v235_v6, %v235_v6 }
 0x135   : > { %v238_v9 = vpop.f32.mrb[2].mxu0 }
 0x136   : > { %242 = vxpose.xlu0.c.b16.start.end [1/1] (short) (narrow) %v241_v8, 16  ;;  %v439_v10 = vpop.f32.mrb[3].mxu0 }
 0x19c   : > { %v250_v11 = vpop.trf.xlu0 }
 0x19d   : > { %443 = vmatmul.mubr.msk.bf16.vlgmr.msra.gmra.mrb[0].mxu1 %vm258_vm2, %v250_v11 }
 0x270   : > { %v300_v12 = vpop.f32.mrb[0].mxu1 }
 0x271   : > { %306 = vst [vmem:[%s195_s20] sm:$0xf] %v300_v12  ;;  %v444_v13 = vpop.f32.mrb[1].mxu1 }
 0x272   : > { %v303_v14 = vpop.f32.mrb[2].mxu1 }
 0x273   : > { %573 = shalt.err (!%p570_p1)
}
 0x274   : > { %s574_s27 = scalar_lea.hbm %s814_s17, 64  ;;  %s578_s6 = scalar_lea.hbm %s858_s2, 128 }
 0x275   : > { %p575_p11 = scmp.ne.s32.totalorder %s814_s17, %s574_s27  ;;  %p579_p4 = scmp.lt.u32.totalorder %s814_s17, %s858_s2 }
 0x276   : > { %p580_p10 = scmp.lt.u32.totalorder %s578_s6, %s574_s27  ;;  %p582_p6 = scmp.lt.u32.totalorder %s574_s27, %s814_s17 }
 0x277   : > { %p576_p12 = pnand %p575_p11, %p871_p13 }
 0x278   : > { %p581_p3 = por %p580_p10, %p579_p4 }
 0x279   : > { %p577_p2 = pneg %p576_p12 }
 0x27a   : > { %p583_p7 = por %p582_p6, %p581_p3 }
 0x27c   : > { %p584_p5 = pnand %p583_p7, %p577_p2 }
 0x27e   : > { %587 = shalt.err (!%p584_p5)
}
 0x27f   : > { %450 = dma.vmem_to_hbm [thread:$0]  (%p871_p13), %s809_s14, 64, %s814_s17, %s308_s19   ;;  %v445_v15 = vpop.f32.mrb[3].mxu1 }
 0x280 PF: > { %s333_s3 = sand.u32 1, %s618_s9   ;;  %p872_p8 = scmp.ne.s32.totalorder %s864_s22, 0 }
 0x281   : > { %p873_p9 = scmp.ge.s32.totalorder %s630_s12, 2  ;;  %s334_s26 = scalar_lea.sflag [#allocation4], %s333_s3 }
 0x283   : > { %p460_p0 = pnand %p873_p9, %p872_p8 }
 0x285   : > { %613 = dma.done.wait (!%p460_p0), %s334_s26, 64  }
 0x286   : > { %615 = vsyncadd (!%p460_p0), %s334_s26, 4294967232  ;;  %p18_p1 = scmp.ge.s32.totalorder %s677_s15, 4   ;;  %s874_s9 = smov %s622_s10 }
 0x287   : > { %s875_s10 = smov %s626_s11  ;;  %s876_s11 = smov %s689_s18 }
 0x288   : > { %s877_s12 = smov %s677_s15  ;;  %20 = sbr.rel (!%p18_p1) target bundleno = 7 (0x7), region = 86 }
 0x28f   :  { %339 = vsyncpa [#allocation3], 1 }
 0x290   :  { %341 = vsyncpa [#allocation3 + $0x1], 1 }
 0x291   :  { %342 = vsyncpa [#allocation6], 1 }
 0x292   :  { %344 = vsyncpa [#allocation6 + $0x1], 1 }
 0x293   :  { %345 = vsyncpa [#allocation4], 1 }
 0x294   :  { %347 = vsyncpa [#allocation4 + $0x1], 1 }

</bundles_post_ra>
